<compile_context>
chip_gen: v7x
topology: tpu7x:2x2x1
jax: 0.10.0
libtpu: 0.0.40
codegen_flags: <defaults>
</compile_context>

<pallas_src>
import functools

import jax
import jax.numpy as jnp
from jax import lax
from jax.experimental import pallas as pl
from jax.experimental.pallas import tpu as pltpu


def _round_up(x, m):
    return ((x + m - 1) // m) * m


def _vmem_capacity_bytes():
    """Per-core VMEM capacity; conservative 64 MiB (v7x) fallback."""
    try:
        info = pltpu.get_tpu_info()
        cap = getattr(info, "vmem_capacity_bytes", None)
        if cap:
            return int(cap)
    except Exception:
        pass
    return 64 * 1024 * 1024


def _num_tensorcores():
    """TensorCores per chip; default 1 (correct for v5e/v6e, safe everywhere)."""
    try:
        info = pltpu.get_tpu_info()
        for name in ("num_cores", "core_count", "num_tensorcores",
                     "tensor_cores_per_chip", "cores_per_chip"):
            v = getattr(info, name, None)
            if isinstance(v, int) and v > 0:
                return min(int(v), 2)
    except Exception:
        pass
    try:
        v = getattr(jax.devices()[0], "num_cores", None)
        if isinstance(v, int) and v > 0:
            return min(int(v), 2)
    except Exception:
        pass
    return 1


def _choose_tiling(B, C, S, itemsize, vmem_cap):
    """Largest (block_c, block_s) whose pipeline footprint fits ~40% of VMEM."""
    budget = max(int(0.40 * vmem_cap), 4 << 20)

    def tile_bytes(bc, bs):
        return (2 * B * bc * bs * itemsize      # double-buffered logits tiles
                + 2 * B * bs * 4                # double-buffered label tiles
                + 6 * B * bc * bs * 4           # in-kernel f32 temporaries
                + 4 * bs * 4)                   # output accumulator blocks

    max_bs = min(1024, _round_up(S, 128))       # lane-dense, up to 1024 lanes

    # Prefer a full-extent class block (no class tiling, no class mask).
    bs = max_bs
    while bs > 128 and tile_bytes(C, bs) > budget:
        bs -= 128
    if tile_bytes(C, bs) <= budget or C <= 8:
        return C, bs

    # Large B*C: tile the class axis (sublane multiple of 8).
    bc = max(8, (C // 8) * 8)
    while bc > 8 and tile_bytes(bc, 128) > budget:
        bc -= 8
    bs = 128
    while bs + 128 <= max_bs and tile_bytes(bc, bs + 128) <= budget:
        bs += 128
    return bc, bs


def _pow_const(x, gamma):
    """x ** gamma with gamma a compile-time constant; small integer gammas use
    repeated multiply (VPU) instead of float pow (EUP exp+log)."""
    g = float(gamma)
    if g.is_integer() and 0 <= int(g) <= 8:
        n = int(g)
        if n == 0:
            return jnp.ones_like(x)
        r = x
        for _ in range(n - 1):
            r = r * x
        return r
    return x ** g


def _focal_loss_kernel(logits_ref, labels_ref, out_ref, *, gamma, seq_len,
                       num_classes, block_c, block_s, tiles_per_split,
                       mask_classes):
    # logits_ref: (B, block_c, block_s) native dtype
    # labels_ref: (B, block_s) int32
    # out_ref:    (1, 1, block_s) f32 partial-sum accumulator (per split)
    p = pl.program_id(0)            # core-split axis    ("parallel")
    c = pl.program_id(1)            # class-tile axis    ("arbitrary" reduction)
    s = pl.program_id(2)            # seq-tile axis      ("arbitrary" reduction)

    @pl.when(jnp.logical_and(c == 0, s == 0))
    def _():
        out_ref[...] = jnp.zeros_like(out_ref)

    tile_start = (p * tiles_per_split + s) * block_s

    # Skip exp/VPU work on fully-padded seq tiles (DMA still pipelined).
    @pl.when(tile_start < seq_len)
    def _():
        x = logits_ref[...].astype(jnp.float32)           # (B, bc, bs)
        labels = labels_ref[...]                           # (B, bs) int32

        # log_softmax over dim 0 (batch): legacy implicit-dim F.log_softmax.
        m = jnp.max(x, axis=0, keepdims=True)
        lse = jnp.log(jnp.sum(jnp.exp(x - m), axis=0, keepdims=True)) + m
        log_p = x - lse                                     # (B, bc, bs)

        # one-hot-free focal factor (pt == 0 off-target):
        #   fl / (-alpha) = log_p * where(is_target, (1 - log_p)**gamma, 1)
        cls = c * block_c + lax.broadcasted_iota(jnp.int32, x.shape, 1)
        is_target = cls == labels[:, None, :]
        factor = jnp.where(is_target, _pow_const(1.0 - log_p, gamma), 1.0)
        contrib = log_p * factor                            # (B, bc, bs)

        # Reduce batch first, then (optionally) mask padded classes on the
        # (1, bc, bs) slab, then reduce classes.
        red = jnp.sum(contrib, axis=0, keepdims=True)       # (1, bc, bs)
        if mask_classes:
            c_iota = lax.broadcasted_iota(jnp.int32, (1, block_c, 1), 1)
            red = jnp.where(c * block_c + c_iota < num_classes, red, 0.0)
        partial = jnp.sum(red, axis=1, keepdims=True)       # (1, 1, bs)

        # Seq-padding mask applied AFTER the (B, C) reduce (padded columns
        # are finite, so masking the reduced slab is exact).
        s_iota = lax.broadcasted_iota(jnp.int32, (1, 1, block_s), 2)
        partial = jnp.where(tile_start + s_iota < seq_len, partial, 0.0)

        out_ref[...] += partial


def focal_loss(logits, labels, gamma=2, alpha=1, size_average=True):
    # ---- plain-JAX preamble reproducing the PyTorch reshapes ---------------
    if labels.ndim > 2:
        labels = labels.reshape(labels.shape[0], labels.shape[1], -1)
        labels = jnp.swapaxes(labels, 1, 2)
        labels = jnp.squeeze(labels.reshape(-1, labels.shape[2]))
    if logits.ndim > 3:
        # TODO(synk): express this permutation through the BlockSpec index_map
        # instead of materialising a transposed HBM copy of the logits.
        logits = logits.reshape(logits.shape[0], logits.shape[1],
                                logits.shape[2], -1)
        logits = jnp.swapaxes(logits, 2, 3)
        logits = jnp.squeeze(logits.reshape(-1, logits.shape[1],
                                            logits.shape[3]))
    assert logits.shape[0] == labels.shape[0]
    assert logits.shape[2] == labels.shape[1]

    B, C, S = logits.shape
    labels = labels.astype(jnp.int32)
    itemsize = jnp.dtype(logits.dtype).itemsize

    # ---- generation-aware tiling -------------------------------------------
    vmem_cap = _vmem_capacity_bytes()
    block_c, block_s = _choose_tiling(B, C, S, itemsize, vmem_cap)

    s_tiles = -(-S // block_s)
    cores = _num_tensorcores()
    num_splits = cores if (cores > 1 and s_tiles >= cores) else 1
    tiles_per_split = -(-s_tiles // num_splits)
    s_pad = num_splits * tiles_per_split * block_s

    n_c_tiles = -(-C // block_c)
    c_pad = n_c_tiles * block_c
    mask_classes = c_pad != C

    if (c_pad != C) or (s_pad != S):
        logits = jnp.pad(logits, ((0, 0), (0, c_pad - C), (0, s_pad - S)))
    if s_pad != S:
        labels = jnp.pad(labels, ((0, 0), (0, s_pad - S)))

    # TODO(synk): for very small C the (block_c, block_s) minor dims still pad
    # C to 8 sublanes; a (C, B, S)-major layout would be ~2x denser in vregs
    # but costs an extra HBM transpose pass in the wrapper.

    kernel = functools.partial(
        _focal_loss_kernel, gamma=gamma, seq_len=S, num_classes=C,
        block_c=block_c, block_s=block_s, tiles_per_split=tiles_per_split,
        mask_classes=mask_classes)

    tile_bytes = (2 * B * block_c * block_s * itemsize + 2 * B * block_s * 4
                  + 6 * B * block_c * block_s * 4 + 4 * block_s * 4)
    vmem_limit = int(min(max(2 * tile_bytes, 32 << 20), (7 * vmem_cap) // 10))

    partials = pl.pallas_call(
        kernel,
        out_shape=jax.ShapeDtypeStruct((num_splits, 1, block_s), jnp.float32),
        grid=(num_splits, n_c_tiles, tiles_per_split),
        in_specs=[
            pl.BlockSpec((B, block_c, block_s),
                         lambda p, c, s: (0, c, p * tiles_per_split + s)),
            pl.BlockSpec((B, block_s),
                         lambda p, c, s: (0, p * tiles_per_split + s)),
        ],
        out_specs=pl.BlockSpec((1, 1, block_s), lambda p, c, s: (p, 0, 0)),
        compiler_params=pltpu.CompilerParams(
            dimension_semantics=("parallel", "arbitrary", "arbitrary"),
            vmem_limit_bytes=vmem_limit),
        cost_estimate=pl.CostEstimate(
            flops=int(10 * B * c_pad * s_pad),
            transcendentals=int(B * c_pad * s_pad),
            bytes_accessed=int(B * c_pad * s_pad * itemsize + B * s_pad * 4
                               + num_splits * block_s * 4)),
    )(logits, labels)

    total = jnp.sum(partials) * (-float(alpha))
    if size_average:
        total = total / (B * C * S)
    return total


if __name__ == "__main__":
    key = jax.random.PRNGKey(0)
    k1, k2 = jax.random.split(key)

    B, C, S = 2, 4, 8  # batch, labels_length, seq_length
    logits = jax.random.normal(k1, (B, C, S), dtype=jnp.float32)
    labels = jax.random.randint(k2, (B, S), 0, C, dtype=jnp.int32)

    loss = focal_loss(logits, labels, gamma=2, alpha=1, size_average=True)
    loss = jax.block_until_ready(loss)

    # pure-JAX reference (same semantics as the PyTorch forward)
    m = jnp.max(logits, axis=0, keepdims=True)
    log_p = logits - (jnp.log(jnp.sum(jnp.exp(logits - m), axis=0,
                                      keepdims=True)) + m)
    onehot = jax.nn.one_hot(labels, C, axis=1, dtype=jnp.float32)
    fl_ref = -1.0 * (1.0 - onehot * log_p) ** 2 * log_p
    ref = fl_ref.mean()
    assert jnp.allclose(loss, ref, atol=1e-5, rtol=1e-4), (loss, ref)

    print("KERNEL_OK")
</pallas_src>

<mosaic_0001>
module attributes {stable_mosaic.version = 11 : i64} {
  func.func @_focal_loss_kernel(%arg0: i32, %arg1: i32, %arg2: i32, %arg3: memref<2x4x128xf32, #tpu.memory_space<vmem>>, %arg4: memref<2x128xi32, #tpu.memory_space<vmem>>, %arg5: memref<1x1x128xf32, #tpu.memory_space<vmem>>) attributes {dimension_semantics = [#tpu.dimension_semantics<parallel>, #tpu.dimension_semantics<arbitrary>, #tpu.dimension_semantics<arbitrary>], iteration_bounds = array<i64: 1, 1, 1>, scalar_prefetch = 0 : i64, scratch_operands = 0 : i64, tpu.core_type = #tpu.core_type<tc>, window_params = [{transform_indices = @transform_0, window_bounds = array<i64: 2, 4, 128>}, {transform_indices = @transform_1, window_bounds = array<i64: 2, 128>}, {transform_indices = @transform_2, window_bounds = array<i64: 1, 1, 128>}]} {
    %c0_i32 = arith.constant 0 : i32
    %0 = arith.cmpi eq, %arg1, %c0_i32 : i32
    %c0_i32_0 = arith.constant 0 : i32
    %1 = arith.cmpi eq, %arg2, %c0_i32_0 : i32
    %2 = arith.andi %0, %1 : i1
    %3 = arith.extui %2 : i1 to i32
    %c0_i32_1 = arith.constant 0 : i32
    %4 = arith.cmpi ne, %3, %c0_i32_1 : i32
    scf.if %4 {
      %cst = arith.constant 0.000000e+00 : f32
      %11 = vector.broadcast %cst : f32 to vector<1x1x128xf32>
      %c0 = arith.constant 0 : index
      %c0_3 = arith.constant 0 : index
      %c0_4 = arith.constant 0 : index
      %12 = vector.load %arg5[%c0, %c0_3, %c0_4] : memref<1x1x128xf32, #tpu.memory_space<vmem>>, vector<1x1x128xf32>
      tpu.vector_store %arg5[%c0, %c0_3, %c0_4], %11 {strides = array<i32>} : memref<1x1x128xf32, #tpu.memory_space<vmem>>, vector<1x1x128xf32>,
    } else {
    }
    %c1_i32 = arith.constant 1 : i32
    %5 = arith.muli %arg0, %c1_i32 : i32
    %6 = arith.addi %5, %arg2 : i32
    %c128_i32 = arith.constant 128 : i32
    %7 = arith.muli %6, %c128_i32 : i32
    %c8_i32 = arith.constant 8 : i32
    %8 = arith.cmpi slt, %7, %c8_i32 : i32
    %9 = arith.extui %8 : i1 to i32
    %c0_i32_2 = arith.constant 0 : i32
    %10 = arith.cmpi ne, %9, %c0_i32_2 : i32
    scf.if %10 {
      %c0 = arith.constant 0 : index
      %c0_3 = arith.constant 0 : index
      %c0_4 = arith.constant 0 : index
      %11 = vector.load %arg3[%c0, %c0_3, %c0_4] : memref<2x4x128xf32, #tpu.memory_space<vmem>>, vector<2x4x128xf32>
      %c0_5 = arith.constant 0 : index
      %c0_6 = arith.constant 0 : index
      %12 = vector.load %arg4[%c0_5, %c0_6] : memref<2x128xi32, #tpu.memory_space<vmem>>, vector<2x128xi32>
      %cst = arith.constant dense<0xFF800000> : vector<4x128xf32>
      %13 = vector.multi_reduction <maximumf>, %11, %cst [0] : vector<2x4x128xf32> to vector<4x128xf32>
      %14 = vector.shape_cast %13 : vector<4x128xf32> to vector<1x4x128xf32>
      %15 = vector.broadcast %14 : vector<1x4x128xf32> to vector<2x4x128xf32>
      %16 = arith.subf %11, %15 : vector<2x4x128xf32>
      %17 = math.exp %16 : vector<2x4x128xf32>
      %cst_7 = arith.constant dense<0.000000e+00> : vector<4x128xf32>
      %18 = vector.multi_reduction <add>, %17, %cst_7 [0] : vector<2x4x128xf32> to vector<4x128xf32>
      %19 = vector.shape_cast %18 : vector<4x128xf32> to vector<1x4x128xf32>
      %20 = math.log %19 : vector<1x4x128xf32>
      %21 = arith.addf %20, %14 : vector<1x4x128xf32>
      %22 = vector.broadcast %21 : vector<1x4x128xf32> to vector<2x4x128xf32>
      %23 = arith.subf %11, %22 : vector<2x4x128xf32>
      %c4_i32 = arith.constant 4 : i32
      %24 = arith.muli %arg1, %c4_i32 : i32
      %25 = tpu.iota {dimensions = array<i32: 1>} : vector<2x4x128xi32>
      %26 = vector.broadcast %24 : i32 to vector<2x4x128xi32>
      %27 = arith.addi %26, %25 : vector<2x4x128xi32>
      %28 = vector.shape_cast %12 : vector<2x128xi32> to vector<2x1x128xi32>
      %29 = vector.broadcast %28 : vector<2x1x128xi32> to vector<2x4x128xi32>
      %30 = arith.cmpi eq, %27, %29 : vector<2x4x128xi32>
      %cst_8 = arith.constant 1.000000e+00 : f32
      %31 = vector.broadcast %cst_8 : f32 to vector<2x4x128xf32>
      %32 = arith.subf %31, %23 : vector<2x4x128xf32>
      %33 = arith.mulf %32, %32 : vector<2x4x128xf32>
      %cst_9 = arith.constant 1.000000e+00 : f32
      %34 = vector.broadcast %cst_9 : f32 to vector<2x4x128xf32>
      %35 = arith.select %30, %33, %34 : vector<2x4x128xi1>, vector<2x4x128xf32>
      %36 = arith.mulf %23, %35 : vector<2x4x128xf32>
      %cst_10 = arith.constant dense<0.000000e+00> : vector<4x128xf32>
      %37 = vector.multi_reduction <add>, %36, %cst_10 [0] : vector<2x4x128xf32> to vector<4x128xf32>
      %38 = vector.shape_cast %37 : vector<4x128xf32> to vector<1x4x128xf32>
      %cst_11 = arith.constant dense<0.000000e+00> : vector<1x128xf32>
      %39 = vector.multi_reduction <add>, %38, %cst_11 [1] : vector<1x4x128xf32> to vector<1x128xf32>
      %40 = vector.shape_cast %39 : vector<1x128xf32> to vector<1x1x128xf32>
      %41 = tpu.iota {dimensions = array<i32: 2>} : vector<1x1x128xi32>
      %42 = vector.broadcast %7 : i32 to vector<1x1x128xi32>
      %43 = arith.addi %42, %41 : vector<1x1x128xi32>
      %c8_i32_12 = arith.constant 8 : i32
      %44 = vector.broadcast %c8_i32_12 : i32 to vector<1x1x128xi32>
      %45 = arith.cmpi slt, %43, %44 : vector<1x1x128xi32>
      %cst_13 = arith.constant 0.000000e+00 : f32
      %46 = vector.broadcast %cst_13 : f32 to vector<1x1x128xf32>
      %47 = arith.select %45, %40, %46 : vector<1x1x128xi1>, vector<1x1x128xf32>
      %c0_14 = arith.constant 0 : index
      %c0_15 = arith.constant 0 : index
      %c0_16 = arith.constant 0 : index
      %48 = vector.load %arg5[%c0_14, %c0_15, %c0_16] : memref<1x1x128xf32, #tpu.memory_space<vmem>>, vector<1x1x128xf32>
      %49 = arith.addf %48, %47 : vector<1x1x128xf32>
      %c0_17 = arith.constant 0 : index
      %c0_18 = arith.constant 0 : index
      %c0_19 = arith.constant 0 : index
      %50 = vector.load %arg5[%c0_17, %c0_18, %c0_19] : memref<1x1x128xf32, #tpu.memory_space<vmem>>, vector<1x1x128xf32>
      tpu.vector_store %arg5[%c0_17, %c0_18, %c0_19], %49 {strides = array<i32>} : memref<1x1x128xf32, #tpu.memory_space<vmem>>, vector<1x1x128xf32>,
    } else {
    }
    return
  }
  func.func @transform_0(%arg0: i32, %arg1: i32, %arg2: i32) -> (i32, i32, i32) {
    %c1_i32 = arith.constant 1 : i32
    %0 = arith.muli %arg0, %c1_i32 : i32
    %1 = arith.addi %0, %arg2 : i32
    %c0_i32 = arith.constant 0 : i32
    %c0_i32_0 = arith.constant 0 : i32
    return %c0_i32, %arg1, %1 : i32, i32, i32
  }
  func.func @transform_1(%arg0: i32, %arg1: i32, %arg2: i32) -> (i32, i32) {
    %c1_i32 = arith.constant 1 : i32
    %0 = arith.muli %arg0, %c1_i32 : i32
    %1 = arith.addi %0, %arg2 : i32
    %c0_i32 = arith.constant 0 : i32
    %c0_i32_0 = arith.constant 0 : i32
    return %c0_i32, %1 : i32, i32
  }
  func.func @transform_2(%arg0: i32, %arg1: i32, %arg2: i32) -> (i32, i32, i32) {
    %c0_i32 = arith.constant 0 : i32
    %c0_i32_0 = arith.constant 0 : i32
    %c0_i32_1 = arith.constant 0 : i32
    return %arg0, %c0_i32, %c0_i32_0 : i32, i32, i32
  }
}

</mosaic_0001>

<bundles_post_ra>
// kernel: tpu_custom_call.1
= control target key start
LH: loop header
LB: loop body
LE: loop exit
PB: predicated region body
PF: predicated region fallthrough
CT: control target
= control target key end

     0   :  { %7 = vsyncpa [#allocation3], 0  ;;  %s282_s0 = inlined_call_operand.hbm [shape: f32[2,4,128], index: 0, kind: input, shape index: {}]   ;;  %s283_s1 = inlined_call_operand.vmem [shape: s32[2,128], index: 1, kind: input, shape index: {}]   ;;  %s284_s2 = inlined_call_operand.hbm [shape: f32[1,1,128], index: 2, kind: output, shape index: {}]  }
   0x1   :  { %8 = vsyncpa [#allocation4], 0  ;;  %s227_s9 = smov [#allocation2]   ;;  %s179_s13 = scalar_lea.hbm %s282_s0, 128 }
   0x2   :  { %s17_s10 = sshll.u32 %s227_s9, 4  ;;  %p180_p0 = scmp.ne.s32.totalorder %s282_s0, %s179_s13  ;;  %s18_s10 = int_to_ptr.vmem [resolvable:$true] %s17_s10 }
   0x3   :  { %p183_p1 = scmp.lt.u32.totalorder %s179_s13, %s282_s0 }
   0x5   :  { %p185_p2 = pnand %p183_p1, %p180_p0 }
   0x7   :  { %188 = shalt.err (!%p185_p2)
}
   0x8   :  { %s189_s18 = scalar_lea.vmem %s18_s10, 128  ;;  %p194_p4 = scmp.lt.s32.totalorder %s18_s10, %s18_s10 }
   0x9   :  { %p190_p3 = scmp.ne.s32.totalorder %s18_s10, %s189_s18  ;;  %p195_p5 = scmp.lt.s32.totalorder %s189_s18, %s189_s18 }
   0xb   :  { %p196_p6 = por %p195_p5, %p194_p4 }
   0xd   :  { %p197_p7 = pnand %p196_p6, %p190_p3 }
   0xf   :  { %200 = shalt.err (!%p197_p7)
}
  0x10   :  { %s228_s19 = smov 64   ;;  %s229_s20 = smov 4  }
  0x11   :  { %23 = dma.hbm_to_vmem [thread:$0]  %s282_s0, 128, %s18_s10, [#allocation3], %s228_s19, %s228_s19, %s229_s20  }
  0x12   :  { %223 = dma.done.wait [#allocation3], 128  }
  0x13   :  { %224 = vsyncadd [#allocation3], 4294967168  ;;  %v230_v0 = vmov 0.0   ;;  %vm63_vm0 = vcmask 1043456   ;;  %v60_v1 = vld [vmem:[#allocation2] sm:$0xf]  ;;  %v82_v15 = vlaneseq }
  0x14   :  { %53 = vst [vmem:[#allocation5] sm:$0x1] %v230_v0  ;;  %v61_v2 = vld [vmem:[#allocation2 + $0x4] sm:$0xf]  ;;  %v64_v3 = vsel %vm63_vm0, %v60_v1, -inf }
  0x15   :  { %v65_v4 = vsel %vm63_vm0, %v61_v2, -inf  ;;  %v231_v16 = vmov 1966171168   ;;  %v83_v18 = vshrl.u32 %v82_v15, 7  ;;  %v137_v48 = vand.u32 127, %v82_v15 }
  0x16   :  { %v66_v5 = vmax.f32 %v64_v3, %v65_v4  ;;  %v95_v17 = vunpack.c.l.s4 %v231_v16  ;;  %v166_v20 = vld.sshfl [vmem:[%s283_s1] sm:$0x11 pattern:$0x75316420]  ;;  %s232_s1 = smov [#allocation5]  }
  0x17   :  { %v93_v21 = vcombine.high %v166_v20, %v166_v20  ;;  %v110_v26 = vsub.s32 0, %v83_v18  ;;  %vm140_vm3 = vcmp.lt.s32.totalorder %v137_v48, 8  ;;  %s151_s24 = sshll.u32 %s232_s1, 4  ;;  %s152_s24 = int_to_ptr.vmem [resolvable:$true] %s151_s24 }
  0x18   :  { %v67_v6 = vsub.f32 %v60_v1, %v66_v5  ;;  %v68_v7 = vsub.f32 %v61_v2, %v66_v5  ;;  %v96_v19 = vunpack.c.0.s8 %v95_v17  ;;  %s201_s25 = scalar_lea.vmem %s152_s24, 16  ;;  %s205_s26 = scalar_lea.vmem %s152_s24, 32 }
  0x19   :  { %p202_p8 = scmp.ne.s32.totalorder %s152_s24, %s201_s25  ;;  %p206_p9 = scmp.lt.s32.totalorder %s152_s24, %s152_s24 }
  0x1a   :  { %v69_v8 = vmul.f32 1.442695, %v67_v6  ;;  %v71_v9 = vmul.f32 1.442695, %v68_v7  ;;  %v99_v22 = vsub.s32 %v96_v19, %v83_v18  ;;  %p207_p10 = scmp.lt.s32.totalorder %s205_s26, %s201_s25 }
  0x1b   :  { %v142_v52 = vld [vmem:[#allocation5] sm:$0x1] }
  0x1c   :  { %173 = vpow2.f32 %v69_v8  ;;  %v100_v24 = vrot.slane %v166_v20, %v99_v22  ;;  %v107_v25 = vrot.slane %v93_v21, %v99_v22  ;;  %p208_p11 = por %p207_p10, %p206_p9 }
  0x1d   :  { %175 = vpow2.f32 %v71_v9 }
  0x1e   :  { %v111_v29 = vrot.slane %v100_v24, %v110_v26  ;;  %v115_v30 = vrot.slane %v107_v25, %v110_v26  ;;  %p209_p12 = pnand %p208_p11, %p202_p8 }
  0x20   :  { %vm116_vm1 = vcmp.eq.s32.totalorder %v83_v18, %v111_v29  ;;  %vm117_vm2 = vcmp.eq.s32.totalorder %v83_v18, %v115_v30 }
  0x26   :  { %v174_v10 = vpop.eup %173 }
  0x27   :  { %v176_v11 = vpop.eup %175  ;;  %v73_v12 = vsel %vm63_vm0, %v174_v10, 0.0 }
  0x28   :  { %v74_v13 = vsel %vm63_vm0, %v176_v11, 0.0 }
  0x29   :  { %v75_v14 = vadd.f32 %v74_v13, %v73_v12 }
  0x2b   :  { %177 = vlog2.f32 %v75_v14 }
  0x35   :  { %v178_v23 = vpop.eup %177 }
  0x36   :  { %v77_v27 = vmul.f32 0.6931472, %v178_v23 }
  0x38   :  { %v78_v28 = vadd.f32 %v77_v27, %v66_v5 }
  0x3a   :  { %v79_v31 = vsub.f32 %v60_v1, %v78_v28  ;;  %v80_v32 = vsub.f32 %v61_v2, %v78_v28 }
  0x3c   :  { %v118_v33 = vsub.f32 1.0, %v79_v31  ;;  %v119_v34 = vsub.f32 1.0, %v80_v32 }
  0x3e   :  { %v120_v35 = vmul.f32 %v118_v33, %v118_v33  ;;  %v121_v36 = vmul.f32 %v119_v34, %v119_v34 }
  0x40   :  { %v122_v37 = vsel %vm116_vm1, %v120_v35, 1.0  ;;  %v123_v38 = vsel %vm117_vm2, %v121_v36, 1.0 }
  0x41   :  { %v124_v39 = vmul.f32 %v122_v37, %v79_v31  ;;  %v125_v40 = vmul.f32 %v123_v38, %v80_v32 }
  0x43   :  { %v126_v41 = vsel %vm63_vm0, %v124_v39, 0.0  ;;  %v127_v42 = vsel %vm63_vm0, %v125_v40, 0.0 }
  0x44   :  { %v128_v43 = vadd.f32 %v127_v42, %v126_v41 }
  0x46   :  { %v129_v44 = vsel %vm63_vm0, %v128_v43, 0.0 }
  0x47   :  { %v130_v45 = vrot.slane %v129_v44, 4 }
  0x49   :  { %v131_v46 = vadd.f32 %v130_v45, %v129_v44 }
  0x4b   :  { %v132_v47 = vrot.slane %v131_v46, 2 }
  0x4d   :  { %v133_v49 = vadd.f32 %v132_v47, %v131_v46 }
  0x4f   :  { %v134_v50 = vrot.slane %v133_v49, 1 }
  0x51   :  { %v135_v51 = vadd.f32 %v134_v50, %v133_v49 }
  0x53   :  { %v141_v53 = vsel %vm140_vm3, %v135_v51, 0.0 }
  0x54   :  { %v143_v54 = vadd.f32 %v142_v52, %v141_v53 }
  0x56   :  { %144 = vst [vmem:[#allocation5] sm:$0x1] %v143_v54 }
  0x57   :  { %212 = shalt.err (!%p209_p12)
}
  0x58   :  { %s213_s29 = scalar_lea.hbm %s284_s2, 16 }
  0x59   :  { %p214_p13 = scmp.ne.s32.totalorder %s284_s2, %s213_s29  ;;  %p217_p0 = scmp.lt.u32.totalorder %s213_s29, %s284_s2 }
  0x5b   :  { %p219_p1 = pnand %p217_p0, %p214_p13 }
  0x5d   :  { %222 = shalt.err (!%p219_p1)
}
  0x5e   :  { %154 = dma.vmem_to_hbm [thread:$0]  %s152_s24, 16, %s284_s2, [#allocation4]  }
  0x5f   :  { %225 = dma.done.wait [#allocation4], 16  }
  0x60   :  { %226 = vsyncadd [#allocation4], 4294967280 }
  0x61   :  { %158 = vsyncpa [#allocation3], 1 }
  0x62   :  { %159 = vsyncpa [#allocation4], 1 }

</bundles_post_ra>
